<compile_context>
chip_gen: v7x
topology: tpu7x:2x2x1
jax: 0.10.0
libtpu: 0.0.40
codegen_flags: <defaults>
</compile_context>

<pallas_src>
import functools

import jax
import jax.numpy as jnp
from jax.experimental import pallas as pl
from jax.experimental.pallas import tpu as pltpu


def _prenorm_kernel(x_ref, g_ref, w_ref, b_ref, o_ref, *, eps, use_mxu):
    # x_ref: (C, TP) block; g_ref: (C, 1); w_ref: (C_out, C); b_ref: (C_out, 1)
    x = x_ref[...].astype(jnp.float32)
    c_in = x.shape[0]

    # Channel LayerNorm; biased variance matches torch.var(unbiased=False).
    # All normalization math stays in fp32 (no bf16 VPU/EUP on v5e).
    mean = jnp.mean(x, axis=0, keepdims=True)              # (1, TP)
    xc = x - mean
    var = jnp.mean(xc * xc, axis=0, keepdims=True)         # (1, TP)
    inv_std = jax.lax.rsqrt(var + eps)                     # (1, TP)
    g = g_ref[...].astype(jnp.float32)                     # (C, 1)
    xn = xc * (inv_std * g)                                # (C, TP)

    b = b_ref[...].astype(jnp.float32)                     # (C_out, 1)
    if use_mxu:
        # Production path (large C): MXU matmul with fp32 accumulation; if the
        # input is bf16 the operands stay bf16 (w is passed in x.dtype).
        y = jnp.dot(w_ref[...], xn.astype(w_ref.dtype),
                    preferred_element_type=jnp.float32) + b
    else:
        # Tiny-C path (demo C=4): do the 1x1 conv as C_in broadcast
        # multiply-adds on the VPU instead of a degenerate MXU matmul.
        w = w_ref[...].astype(jnp.float32)                 # (C_out, C_in)
        y = b
        for c in range(c_in):
            y = y + w[:, c:c + 1] * xn[c:c + 1, :]
    o_ref[...] = y.astype(o_ref.dtype)


def prenorm_1x1conv(x_nchw, g, w, b, *, pixels_per_block=512):
    """PreNorm(dim, Conv2d(dim, dim, 1)) forward.

    x_nchw: (N, C, H, W); g: (C,) LayerNorm gain; w: (C_out, C_in); b: (C_out,).
    Returns (N, C_out, H, W) in x_nchw.dtype.
    """
    N, C, H, W = x_nchw.shape
    C_out = w.shape[0]
    eps = 1e-5 if x_nchw.dtype == jnp.float32 else 1e-3

    HW = H * W
    # Free (contiguous, metadata-only) view: channels stay at dim 1, pixels are
    # flattened into one lane-dense axis.  No HBM transpose pass.
    x3 = x_nchw.reshape(N, C, HW)

    # Pixel tile: large and a multiple of 128 when possible.
    tp = min(pixels_per_block, HW)
    if HW % tp != 0:
        tp = HW  # fallback: one tile per sample (no remainder/padding path yet)

    g2d = g.reshape(C, 1).astype(jnp.float32)
    b2d = b.reshape(C_out, 1).astype(jnp.float32)
    use_mxu = C > 32
    w2d = w.astype(x_nchw.dtype if use_mxu else jnp.float32)

    kernel = functools.partial(_prenorm_kernel, eps=eps, use_mxu=use_mxu)

    out3 = pl.pallas_call(
        kernel,
        out_shape=jax.ShapeDtypeStruct((N, C_out, HW), x_nchw.dtype),
        grid_spec=pltpu.PrefetchScalarGridSpec(
            num_scalar_prefetch=0,
            grid=(N, HW // tp),
            in_specs=[
                # Streaming input: (1, C, TP) block, first dim squeezed.
                pl.BlockSpec((None, C, tp), lambda n, p: (n, 0, p)),
                # Grid-invariant operands (for production-sized C also set
                # pipeline_mode=pl.Buffered(1) here to skip double-buffering).
                pl.BlockSpec((C, 1), lambda n, p: (0, 0)),
                pl.BlockSpec((C_out, C), lambda n, p: (0, 0)),
                pl.BlockSpec((C_out, 1), lambda n, p: (0, 0)),
            ],
            out_specs=pl.BlockSpec((None, C_out, tp), lambda n, p: (n, 0, p)),
        ),
        compiler_params=pltpu.CompilerParams(
            # Both grid axes are independent -> shard across 2 TCs on v7x.
            dimension_semantics=("parallel", "parallel")),
    )(x3, g2d, w2d, b2d)

    # Metadata-only reshape back to NCHW.
    return out3.reshape(N, C_out, H, W)


def _reference(x_nchw, g, w, b):
    eps = 1e-5 if x_nchw.dtype == jnp.float32 else 1e-3
    mean = jnp.mean(x_nchw, axis=1, keepdims=True)
    var = jnp.mean((x_nchw - mean) ** 2, axis=1, keepdims=True)  # biased
    xn = (x_nchw - mean) * jax.lax.rsqrt(var + eps) * g.reshape(1, -1, 1, 1)
    y = jnp.einsum("nchw,oc->nohw", xn, w) + b.reshape(1, -1, 1, 1)
    return y


if __name__ == "__main__":
    key = jax.random.PRNGKey(0)
    k_x, k_g, k_w, k_b = jax.random.split(key, 4)

    N, C, H, W = 2, 4, 16, 16
    x = jax.random.normal(k_x, (N, C, H, W), dtype=jnp.float32)

    # LayerNorm.g is ones in PyTorch; perturb slightly so it participates.
    g = jnp.ones((C,), jnp.float32) + 0.01 * jax.random.normal(k_g, (C,), jnp.float32)
    # fn := Conv2d(dim, dim, kernel_size=1) with deterministic weights.
    w = 0.1 * jax.random.normal(k_w, (C, C), jnp.float32)
    b = 0.1 * jax.random.normal(k_b, (C,), jnp.float32)

    out = prenorm_1x1conv(x, g, w, b)
    out = jax.block_until_ready(out)

    ref = _reference(x, g, w, b)
    assert out.shape == (N, C, H, W)
    assert jnp.allclose(out, ref, atol=1e-5, rtol=1e-5), "mismatch vs reference"

    print("KERNEL_OK")
</pallas_src>

<mosaic_0001>
module attributes {stable_mosaic.version = 11 : i64} {
  func.func @_prenorm_kernel(%arg0: i32, %arg1: i32, %arg2: memref<1x4x256xf32, #tpu.memory_space<vmem>>, %arg3: memref<4x1xf32, #tpu.memory_space<vmem>>, %arg4: memref<4x4xf32, #tpu.memory_space<vmem>>, %arg5: memref<4x1xf32, #tpu.memory_space<vmem>>, %arg6: memref<1x4x256xf32, #tpu.memory_space<vmem>>) attributes {dimension_semantics = [#tpu.dimension_semantics<parallel>, #tpu.dimension_semantics<parallel>], iteration_bounds = array<i64: 2, 1>, scalar_prefetch = 0 : i64, scratch_operands = 0 : i64, tpu.core_type = #tpu.core_type<tc>, window_params = [{transform_indices = @transform_0, window_bounds = array<i64: 1, 4, 256>}, {pipeline_mode = #tpu.pipeline_mode<synchronous>, transform_indices = @transform_1, window_bounds = array<i64: 4, 1>}, {pipeline_mode = #tpu.pipeline_mode<synchronous>, transform_indices = @transform_2, window_bounds = array<i64: 4, 4>}, {pipeline_mode = #tpu.pipeline_mode<synchronous>, transform_indices = @transform_3, window_bounds = array<i64: 4, 1>}, {transform_indices = @transform_4, window_bounds = array<i64: 1, 4, 256>}]} {
    %c0 = arith.constant 0 : index
    %c0_0 = arith.constant 0 : index
    %c0_1 = arith.constant 0 : index
    %0 = vector.load %arg2[%c0, %c0_0, %c0_1] : memref<1x4x256xf32, #tpu.memory_space<vmem>>, vector<1x4x256xf32>
    %1 = vector.shape_cast %0 : vector<1x4x256xf32> to vector<4x256xf32>
    %cst = arith.constant dense<0.000000e+00> : vector<256xf32>
    %2 = vector.multi_reduction <add>, %1, %cst [0] : vector<4x256xf32> to vector<256xf32>
    %3 = vector.shape_cast %2 : vector<256xf32> to vector<1x256xf32>
    %cst_2 = arith.constant 4.000000e+00 : f32
    %4 = vector.broadcast %cst_2 : f32 to vector<1x256xf32>
    %5 = arith.divf %3, %4 : vector<1x256xf32>
    %6 = vector.broadcast %5 : vector<1x256xf32> to vector<4x256xf32>
    %7 = arith.subf %1, %6 : vector<4x256xf32>
    %8 = arith.mulf %7, %7 : vector<4x256xf32>
    %cst_3 = arith.constant dense<0.000000e+00> : vector<256xf32>
    %9 = vector.multi_reduction <add>, %8, %cst_3 [0] : vector<4x256xf32> to vector<256xf32>
    %10 = vector.shape_cast %9 : vector<256xf32> to vector<1x256xf32>
    %cst_4 = arith.constant 4.000000e+00 : f32
    %11 = vector.broadcast %cst_4 : f32 to vector<1x256xf32>
    %12 = arith.divf %10, %11 : vector<1x256xf32>
    %cst_5 = arith.constant 9.99999974E-6 : f32
    %13 = vector.broadcast %cst_5 : f32 to vector<1x256xf32>
    %14 = arith.addf %12, %13 : vector<1x256xf32>
    %15 = math.rsqrt %14 : vector<1x256xf32>
    %c0_6 = arith.constant 0 : index
    %c0_7 = arith.constant 0 : index
    %16 = vector.load %arg3[%c0_6, %c0_7] : memref<4x1xf32, #tpu.memory_space<vmem>>, vector<4x1xf32>
    %17 = vector.broadcast %15 : vector<1x256xf32> to vector<4x256xf32>
    %18 = vector.broadcast %16 : vector<4x1xf32> to vector<4x256xf32>
    %19 = arith.mulf %17, %18 : vector<4x256xf32>
    %20 = arith.mulf %7, %19 : vector<4x256xf32>
    %c0_8 = arith.constant 0 : index
    %c0_9 = arith.constant 0 : index
    %21 = vector.load %arg5[%c0_8, %c0_9] : memref<4x1xf32, #tpu.memory_space<vmem>>, vector<4x1xf32>
    %c0_10 = arith.constant 0 : index
    %c0_11 = arith.constant 0 : index
    %22 = vector.load %arg4[%c0_10, %c0_11] : memref<4x4xf32, #tpu.memory_space<vmem>>, vector<4x4xf32>
    %23 = vector.extract_strided_slice %22 {offsets = [0, 0], sizes = [4, 1], strides = [1, 1]} : vector<4x4xf32> to vector<4x1xf32>
    %24 = vector.extract_strided_slice %20 {offsets = [0, 0], sizes = [1, 256], strides = [1, 1]} : vector<4x256xf32> to vector<1x256xf32>
    %25 = vector.broadcast %23 : vector<4x1xf32> to vector<4x256xf32>
    %26 = vector.broadcast %24 : vector<1x256xf32> to vector<4x256xf32>
    %27 = arith.mulf %25, %26 : vector<4x256xf32>
    %28 = vector.broadcast %21 : vector<4x1xf32> to vector<4x256xf32>
    %29 = arith.addf %28, %27 : vector<4x256xf32>
    %30 = vector.extract_strided_slice %22 {offsets = [0, 1], sizes = [4, 1], strides = [1, 1]} : vector<4x4xf32> to vector<4x1xf32>
    %31 = vector.extract_strided_slice %20 {offsets = [1, 0], sizes = [1, 256], strides = [1, 1]} : vector<4x256xf32> to vector<1x256xf32>
    %32 = vector.broadcast %30 : vector<4x1xf32> to vector<4x256xf32>
    %33 = vector.broadcast %31 : vector<1x256xf32> to vector<4x256xf32>
    %34 = arith.mulf %32, %33 : vector<4x256xf32>
    %35 = arith.addf %29, %34 : vector<4x256xf32>
    %36 = vector.extract_strided_slice %22 {offsets = [0, 2], sizes = [4, 1], strides = [1, 1]} : vector<4x4xf32> to vector<4x1xf32>
    %37 = vector.extract_strided_slice %20 {offsets = [2, 0], sizes = [1, 256], strides = [1, 1]} : vector<4x256xf32> to vector<1x256xf32>
    %38 = vector.broadcast %36 : vector<4x1xf32> to vector<4x256xf32>
    %39 = vector.broadcast %37 : vector<1x256xf32> to vector<4x256xf32>
    %40 = arith.mulf %38, %39 : vector<4x256xf32>
    %41 = arith.addf %35, %40 : vector<4x256xf32>
    %42 = vector.extract_strided_slice %22 {offsets = [0, 3], sizes = [4, 1], strides = [1, 1]} : vector<4x4xf32> to vector<4x1xf32>
    %43 = vector.extract_strided_slice %20 {offsets = [3, 0], sizes = [1, 256], strides = [1, 1]} : vector<4x256xf32> to vector<1x256xf32>
    %44 = vector.broadcast %42 : vector<4x1xf32> to vector<4x256xf32>
    %45 = vector.broadcast %43 : vector<1x256xf32> to vector<4x256xf32>
    %46 = arith.mulf %44, %45 : vector<4x256xf32>
    %47 = arith.addf %41, %46 : vector<4x256xf32>
    %c0_12 = arith.constant 0 : index
    %c0_13 = arith.constant 0 : index
    %c0_14 = arith.constant 0 : index
    %48 = vector.load %arg6[%c0_12, %c0_13, %c0_14] : memref<1x4x256xf32, #tpu.memory_space<vmem>>, vector<1x4x256xf32>
    %49 = vector.shape_cast %48 : vector<1x4x256xf32> to vector<4x256xf32>
    %50 = vector.shape_cast %47 : vector<4x256xf32> to vector<1x4x256xf32>
    tpu.vector_store %arg6[%c0_12, %c0_13, %c0_14], %50 {strides = array<i32>} : memref<1x4x256xf32, #tpu.memory_space<vmem>>, vector<1x4x256xf32>,
    return
  }
  func.func @transform_0(%arg0: i32, %arg1: i32) -> (i32, i32, i32) {
    %c0_i32 = arith.constant 0 : i32
    %c0_i32_0 = arith.constant 0 : i32
    return %arg0, %c0_i32, %arg1 : i32, i32, i32
  }
  func.func @transform_1(%arg0: i32, %arg1: i32) -> (i32, i32) {
    %c0_i32 = arith.constant 0 : i32
    %c0_i32_0 = arith.constant 0 : i32
    %c0_i32_1 = arith.constant 0 : i32
    return %c0_i32, %c0_i32_0 : i32, i32
  }
  func.func @transform_2(%arg0: i32, %arg1: i32) -> (i32, i32) {
    %c0_i32 = arith.constant 0 : i32
    %c0_i32_0 = arith.constant 0 : i32
    %c0_i32_1 = arith.constant 0 : i32
    return %c0_i32, %c0_i32_0 : i32, i32
  }
  func.func @transform_3(%arg0: i32, %arg1: i32) -> (i32, i32) {
    %c0_i32 = arith.constant 0 : i32
    %c0_i32_0 = arith.constant 0 : i32
    %c0_i32_1 = arith.constant 0 : i32
    return %c0_i32, %c0_i32_0 : i32, i32
  }
  func.func @transform_4(%arg0: i32, %arg1: i32) -> (i32, i32, i32) {
    %c0_i32 = arith.constant 0 : i32
    %c0_i32_0 = arith.constant 0 : i32
    return %arg0, %c0_i32, %arg1 : i32, i32, i32
  }
}

</mosaic_0001>

<bundles_post_ra>
// kernel: tpu_custom_call.1
= control target key start
LH: loop header
LB: loop body
LE: loop exit
PB: predicated region body
PF: predicated region fallthrough
CT: control target
= control target key end

     0   :  { %9 = vsyncpa [#allocation3], 0  ;;  %s945_s0 = inlined_call_operand.hbm [shape: f32[2,4,256], index: 0, kind: input, shape index: {}]   ;;  %s946_s1 = inlined_call_operand.vmem [shape: f32[4,1], index: 1, kind: input, shape index: {}]   ;;  %s947_s2 = inlined_call_operand.vmem [shape: f32[4,4], index: 2, kind: input, shape index: {}]   ;;  %s948_s3 = inlined_call_operand.vmem [shape: f32[4,1], index: 3, kind: input, shape index: {}]   ;;  %s949_s4 = inlined_call_operand.hbm [shape: f32[2,4,256], index: 4, kind: output, shape index: {}]  }
   0x1   :  { %11 = vsyncpa [#allocation3 + $0x1], 0 }
   0x2   :  { %12 = vsyncpa [#allocation4], 0 }
   0x3   :  { %14 = vsyncpa [#allocation4 + $0x1], 0  ;;  %s756_s15 = smov 0   ;;  %s758_s16 = smov 0  }
   0x4   :  { %s760_s17 = smov 0   ;;  %s762_s18 = smov 0  }
   0x5   :  { %s764_s19 = smov 0   ;;  %s766_s20 = smov 0  }
   0x6 LB: > { %s517_s21 = sadd.s32 4294967295, %s723_s20   ;;  %s518_s22 = sadd.s32 4294967294, %s723_s20   ;;  %s723_s20 = sphi %s766_s20, %s20_s20   ;;  %s719_s19 = sphi %s764_s19, %s965_s19   ;;  %s715_s18 = sphi %s762_s18, %s964_s18   ;;  %s711_s17 = sphi %s760_s17, %s963_s17   ;;  %s707_s16 = sphi %s758_s16, %s962_s16   ;;  %s703_s15 = sphi %s756_s15, %s961_s15  }
   0x7   : > { %s32_s23 = sadd.s32 1, %s719_s19  ;;  %s41_s24 = sadd.s32 1, %s711_s17 }
   0x8   : > { %p34_p0 = scmp.ge.s32.totalorder %s32_s23, 2  ;;  %p48_p1 = scmp.ne.s32.totalorder %s711_s17, %s707_s16 }
   0x9   : > { %p49_p2 = scmp.eq.s32.totalorder %s723_s20, 0  ;;  %p54_p3 = scmp.ne.s32.totalorder %s707_s16, %s703_s15 }
   0xa   : > { %s967_s23 = smov (%p34_p0, %s32_s23), 0  ;;  %p55_p5 = scmp.eq.s32.totalorder %s517_s21, 0 }
   0xb   : > { %p797_p4 = por %p49_p2, %p48_p1  ;;  %s36_s26 = ssub.s32 %s719_s19, %s967_s23 }
   0xc   : > { %p143_p6 = scmp.eq.s32.totalorder %s517_s21, 1  ;;  %p39_p7 = scmp.eq.s32.totalorder %s36_s26, 0 }
   0xd   : > { %p803_p8 = por %p55_p5, %p54_p3  ;;  %p149_p10 = scmp.eq.s32.totalorder %s518_s22, 1 }
   0xe   : > { %p807_p9 = por %p143_p6, %p48_p1  ;;  %p546_p13 = scmp.lt.s32.totalorder %s723_s20, 2 }
   0xf   : > { %s812_s29 = scalar_select %p39_p7, %s711_s17, %s41_s24  }
  0x10   : > { %s953_s28 = scalar_select %p807_p9, 1, 0 }
  0x11   : > { %p814_p11 = por %p149_p10, %p54_p3  ;;  %s178_s5 = sand.u32 1, %s711_s17  }
  0x12   : > { %s521_s6 = sshll.u32 %s178_s5, 3  ;;  %s532_s7 = sshll.u32 %s719_s19, 7 }
  0x13   : > { %s954_s30 = scalar_select %p814_p11, 1, 0 }
  0x14   : > { %s825_s10 = scalar_lea.hbm %s945_s0, %s532_s7  ;;  %s182_s11 = scalar_lea.vmem [#allocation2], %s521_s6 }
  0x15   : > { %s192_s12 = sshll.u32 %s182_s11, 4  ;;  %p831_p0 = pnand %p546_p13, %p797_p4  ;;  %s827_s12 = int_to_ptr.vmem [resolvable:$true] %s192_s12 }
  0x16   : > { %s179_s14 = scalar_lea.sflag [#allocation3], %s178_s5  ;;  %s611_s21 = scalar_lea.hbm %s825_s10, 128 }
  0x17   : > { %p612_p3 = scmp.ne.s32.totalorder %s825_s10, %s611_s21  ;;  %p613_p5 = pneg %p831_p0 }
  0x18   : > { %s616_s25 = scalar_lea.hbm %s945_s0, 256  ;;  %p617_p4 = scmp.lt.u32.totalorder %s825_s10, %s945_s0 }
  0x19   : > { %p614_p6 = pnand %p613_p5, %p612_p3  ;;  %p618_p10 = scmp.lt.u32.totalorder %s616_s25, %s611_s21 }
  0x1a   : > { %p620_p12 = scmp.lt.u32.totalorder %s611_s21, %s825_s10 }
  0x1b   : > { %p615_p7 = pneg %p614_p6  ;;  %p619_p13 = por %p618_p10, %p617_p4 }
  0x1d   : > { %p621_p1 = por %p620_p12, %p619_p13 }
  0x1f   : > { %p622_p2 = pnand %p621_p1, %p615_p7 }
  0x21   : > { %625 = shalt.err (!%p622_p2)
}
  0x22   : > { %s626_s5 = scalar_lea.vmem %s827_s12, 128  ;;  %s725_s7 = smov [#allocation2]  }
  0x23   : > { %p627_p3 = scmp.ne.s32.totalorder %s827_s12, %s626_s5  ;;  %s631_s8 = sshll.u32 %s725_s7, 4  ;;  %s632_s8 = int_to_ptr.vmem [resolvable:$false] %s631_s8 }
  0x24   : > { %s633_s9 = scalar_lea.vmem %s632_s8, 256  ;;  %p634_p9 = scmp.lt.s32.totalorder %s827_s12, %s632_s8 }
  0x25   : > { %p629_p6 = pnand %p627_p3, %p613_p5  ;;  %p635_p4 = scmp.lt.s32.totalorder %s633_s9, %s626_s5 }
  0x27   : > { %p630_p11 = pneg %p629_p6  ;;  %p636_p10 = por %p635_p4, %p634_p9 }
  0x29   : > { %p637_p12 = pnand %p636_p10, %p630_p11 }
  0x2b   : > { %640 = shalt.err (!%p637_p12)
}
  0x2c   : > { %541 = dma.hbm_to_vmem [thread:$0]  (!%p831_p0), %s825_s10, 128, %s827_s12, %s179_s14  }
  0x2d   : > { %p956_p1 = scmp.lt.s32.totalorder %s723_s20, 3  ;;  %p957_p2 = scmp.ge.s32.totalorder %s723_s20, 1 }
  0x2f   : > { %p198_p5 = pnand %p957_p2, %p956_p1 }
  0x30   : > { %s867_s11 = sand.u32 (!%p198_p5), 1, %s707_s16  }
  0x31   : > { %201 = sbr.rel (%p198_p5) target bundleno = 223 (0xdf), region = 36  ;;  %s525_s21 = sshll.u32 (!%p198_p5), %s867_s11, 3 }
  0x32   : > { %s204_s22 = scalar_lea.sflag (!%p198_p5), [#allocation3], %s867_s11  ;;  %s207_s13 = scalar_lea.vmem (!%p198_p5), [#allocation2], %s525_s21 }
  0x38   : > { %694 = dma.done.wait (%p803_p8), %s204_s22, 128  }
  0x39   : > { %696 = vsyncadd (%p803_p8), %s204_s22, 4294967168  ;;  %v726_v0 = vmov 0   ;;  %v298_v1 = vld [vmem:[%s948_s3] sm:$0xf]  ;;  %v727_v4 = vmov 1   ;;  %v728_v5 = vmov 2   ;;  %v306_v47 = vlaneseq }
  0x3a   : > { %601 = vset.pattern.permute.xlu1 %v726_v0  ;;  %600 = vset.pattern.permute.xlu0 %v726_v0  ;;  %v285_v2 = vld [vmem:[%s946_s1] sm:$0xf]  ;;  %v729_v6 = vmov 3   ;;  %vm238_vm0 = vcmask 1043456   ;;  %s533_s27 = sshll.u32 %s715_s18, 7  ;;  %s231_s6 = scalar_lea.vmem [#allocation5], %s525_s21 }
  0x3b   : > { %328 = vperm.xlu1 %601, %v298_v1   ;;  %288 = vperm.xlu0 %600, %v285_v2   ;;  %v299_v3 = vld [vmem:[%s947_s2] sm:$0xf]  ;;  %v307_v50 = vshrl.u32 %v306_v47, 7  ;;  %s433_s5 = sshll.u32 %s231_s6, 4  ;;  %s896_s9 = scalar_lea.hbm %s949_s4, %s533_s27  ;;  %s898_s5 = int_to_ptr.vmem [resolvable:$true] %s433_s5 }
  0x3c   : > { %v234_v7 = vld [vmem:[%s207_s13] sm:$0xff]  ;;  %s417_s22 = scalar_lea.sflag [#allocation4], %s867_s11  ;;  %s641_s13 = scalar_lea.vmem %s898_s5, 128 }
  0x3d   : > { %v236_v8 = vcombine.high %v234_v7, %v234_v7  ;;  %v239_v9 = vsel %vm238_vm0, %v234_v7, 0.0  ;;  %v308_v55 = vsub.s32 0, %v307_v50  ;;  %v312_v57 = vsub.s32 4, %v307_v50  ;;  %p642_p8 = scmp.ne.s32.totalorder %s898_s5, %s641_s13  ;;  %p958_p9 = scmp.ne.s32.totalorder %s953_s28, 0 }
  0x3e   : > { %v240_v11 = vrot.slane %v239_v9, 4  ;;  %v339_v58 = vsub.s32 1, %v307_v50  ;;  %v343_v59 = vsub.s32 5, %v307_v50  ;;  %v391_v60 = vsub.s32 3, %v307_v50  ;;  %s730_s18 = smov [#allocation5]  }
  0x3f   : > { %602 = vset.pattern.permute.xlu1 %v727_v4  ;;  %302 = vperm.xlu0 %600, %v299_v3   ;;  %v246_v10 = vsel %vm238_vm0, %v236_v8, 0.0  ;;  %v395_v61 = vsub.s32 7, %v307_v50  ;;  %v365_v62 = vsub.s32 2, %v307_v50  ;;  %v369_v63 = vsub.s32 6, %v307_v50  ;;  %p643_p11 = pnand %p642_p8, %p958_p9  ;;  %s645_s21 = sshll.u32 %s730_s18, 4  ;;  %s646_s21 = int_to_ptr.vmem [resolvable:$false] %s645_s21 }
  0x40   : > { %334 = vperm.xlu1 %602, %v299_v3   ;;  %v247_v12 = vrot.slane %v246_v10, 4  ;;  %v241_v13 = vadd.f32 %v240_v11, %v239_v9  ;;  %s647_s10 = scalar_lea.vmem %s646_s21, 256  ;;  %p648_p7 = scmp.lt.s32.totalorder %s898_s5, %s646_s21 }
  0x41   : > { %p644_p0 = pneg %p643_p11  ;;  %p649_p13 = scmp.lt.s32.totalorder %s647_s10, %s641_s13 }
  0x42   : > { %v248_v14 = vadd.f32 %v247_v12, %v246_v10  ;;  %v242_v15 = vrot.slane %v241_v13, 2 }
  0x43   : > { %603 = vset.pattern.permute.xlu0 %v728_v5  ;;  %p650_p3 = por %p649_p13, %p648_p7 }
  0x44   : > { %604 = vset.pattern.permute.xlu1 %v729_v6  ;;  %360 = vperm.xlu0 %603, %v299_v3   ;;  %v249_v16 = vrot.slane %v248_v14, 2  ;;  %v243_v17 = vadd.f32 %v242_v15, %v241_v13 }
  0x45   : > { %386 = vperm.xlu1 %604, %v299_v3   ;;  %p651_p6 = pnand %p650_p3, %p644_p0 }
  0x46   : > { %v250_v18 = vadd.f32 %v249_v16, %v248_v14  ;;  %v244_v19 = vrot.slane %v243_v17, 1 }
  0x48   : > { %605 = vset.pattern.permute.xlu0 %v729_v6  ;;  %v251_v20 = vrot.slane %v250_v18, 1  ;;  %v245_v21 = vadd.f32 %v244_v19, %v243_v17 }
  0x4a   : > { %v252_v22 = vadd.f32 %v251_v20, %v250_v18  ;;  %v254_v23 = vmul.f32 0.25, %v245_v21 }
  0x4c   : > { %v255_v24 = vmul.f32 0.25, %v252_v22 }
  0x4e   : > { %v258_v25 = vcombine.low %v254_v23, %v255_v24 }
  0x50   : > { %v260_v26 = vsub.f32 %v234_v7, %v258_v25 }
  0x52   : > { %v261_v27 = vmul.f32 %v260_v26, %v260_v26 }
  0x54   : > { %v263_v28 = vcombine.high %v261_v27, %v261_v27  ;;  %v265_v29 = vsel %vm238_vm0, %v261_v27, 0.0 }
  0x55   : > { %v266_v31 = vrot.slane %v265_v29, 4 }
  0x56   : > { %v272_v30 = vsel %vm238_vm0, %v263_v28, 0.0 }
  0x57   : > { %v273_v32 = vrot.slane %v272_v30, 4  ;;  %v267_v33 = vadd.f32 %v266_v31, %v265_v29 }
  0x59   : > { %v274_v34 = vadd.f32 %v273_v32, %v272_v30  ;;  %v268_v35 = vrot.slane %v267_v33, 2 }
  0x5b   : > { %v275_v36 = vrot.slane %v274_v34, 2  ;;  %v269_v37 = vadd.f32 %v268_v35, %v267_v33 }
  0x5d   : > { %v276_v38 = vadd.f32 %v275_v36, %v274_v34  ;;  %v270_v39 = vrot.slane %v269_v37, 1 }
  0x5f   : > { %v277_v40 = vrot.slane %v276_v38, 1  ;;  %v271_v41 = vadd.f32 %v270_v39, %v269_v37 }
  0x61   : > { %v278_v42 = vadd.f32 %v277_v40, %v276_v38  ;;  %v279_v43 = vmul.f32 0.25, %v271_v41 }
  0x63   : > { %v280_v44 = vmul.f32 0.25, %v278_v42  ;;  %v281_v45 = vadd.f32 1e-05, %v279_v43 }
  0x65   : > { %v282_v46 = vadd.f32 1e-05, %v280_v44  ;;  %607 = vrsqrt.f32 %v281_v45 }
  0x67   : > { %609 = vrsqrt.f32 %v282_v46 }
  0x6f   : > { %v608_v48 = vpop.eup %607 }
  0x71   : > { %v610_v49 = vpop.eup %609 }
  0xba   : > { %v289_v51 = vpop.permute.xlu0 %288  ;;  %v329_v54 = vpop.permute.xlu1 %328 }
  0xbb   : > { %v291_v52 = vmul.f32 %v608_v48, %v289_v51  ;;  %v292_v53 = vmul.f32 %v610_v49, %v289_v51 }
  0xbd   : > { %v295_v56 = vcombine.low %v291_v52, %v292_v53 }
  0xbe   : > { %v303_v5 = vpop.permute.xlu0 %302 }
  0xbf   : > { %v297_v0 = vmul.f32 %v295_v56, %v260_v26  ;;  %v335_v6 = vpop.permute.xlu1 %334 }
  0xc1   : > { %v309_v1 = vrot.slane %v297_v0, %v308_v55  ;;  %v313_v2 = vrot.slane %v297_v0, %v312_v57  ;;  %v340_v3 = vrot.slane %v297_v0, %v339_v58  ;;  %v344_v4 = vrot.slane %v297_v0, %v343_v59 }
  0xc2   : > { %v392_v7 = vrot.slane %v297_v0, %v391_v60  ;;  %v396_v8 = vrot.slane %v297_v0, %v395_v61  ;;  %v366_v9 = vrot.slane %v297_v0, %v365_v62  ;;  %v370_v10 = vrot.slane %v297_v0, %v369_v63 }
  0xc3   : > { %v319_v11 = vrot.slane %v309_v1, %v308_v55  ;;  %v323_v12 = vrot.slane %v313_v2, %v308_v55  ;;  %v350_v13 = vrot.slane %v340_v3, %v339_v58  ;;  %v354_v14 = vrot.slane %v344_v4, %v339_v58  ;;  %v361_v21 = vpop.permute.xlu0 %360 }
  0xc4   : > { %v376_v17 = vrot.slane %v366_v9, %v365_v62  ;;  %v380_v18 = vrot.slane %v370_v10, %v365_v62  ;;  %v402_v19 = vrot.slane %v392_v7, %v391_v60  ;;  %v406_v20 = vrot.slane %v396_v8, %v391_v60  ;;  %v387_v26 = vpop.permute.xlu1 %386 }
  0xc5   : > { %v324_v15 = vmul.f32 %v319_v11, %v303_v5  ;;  %v325_v16 = vmul.f32 %v323_v12, %v303_v5  ;;  %v355_v24 = vmul.f32 %v350_v13, %v335_v6  ;;  %v356_v25 = vmul.f32 %v354_v14, %v335_v6 }
  0xc6   : > { %v381_v29 = vmul.f32 %v376_v17, %v361_v21  ;;  %v382_v30 = vmul.f32 %v380_v18, %v361_v21  ;;  %v407_v31 = vmul.f32 %v402_v19, %v387_v26  ;;  %v408_v32 = vmul.f32 %v406_v20, %v387_v26 }
  0xc7   : > { %v331_v22 = vadd.f32 %v329_v54, %v324_v15  ;;  %v332_v23 = vadd.f32 %v329_v54, %v325_v16 }
  0xc9   : > { %v357_v27 = vadd.f32 %v355_v24, %v331_v22  ;;  %v358_v28 = vadd.f32 %v356_v25, %v332_v23 }
  0xcb   : > { %v383_v33 = vadd.f32 %v381_v29, %v357_v27  ;;  %v384_v34 = vadd.f32 %v382_v30, %v358_v28 }
  0xcd   : > { %v409_v35 = vadd.f32 %v407_v31, %v383_v33  ;;  %v410_v36 = vadd.f32 %v408_v32, %v384_v34 }
  0xcf   : > { %v413_v37 = vcombine.low %v409_v35, %v410_v36 }
  0xd1   : > { %415 = vst [vmem:[%s231_s6] sm:$0xff] %v413_v37 }
  0xd2   : > { %654 = shalt.err (!%p651_p6)
}
  0xd3   : > { %s655_s11 = scalar_lea.hbm %s896_s9, 128  ;;  %s659_s24 = scalar_lea.hbm %s949_s4, 256 }
  0xd4   : > { %p656_p4 = scmp.ne.s32.totalorder %s896_s9, %s655_s11  ;;  %p660_p1 = scmp.lt.u32.totalorder %s896_s9, %s949_s4 }
  0xd5   : > { %p661_p2 = scmp.lt.u32.totalorder %s659_s24, %s655_s11  ;;  %p663_p8 = scmp.lt.u32.totalorder %s655_s11, %s896_s9 }
  0xd6   : > { %p657_p10 = pnand %p656_p4, %p958_p9 }
  0xd7   : > { %p662_p5 = por %p661_p2, %p660_p1 }
  0xd8   : > { %p658_p12 = pneg %p657_p10 }
  0xd9   : > { %p664_p11 = por %p663_p8, %p662_p5 }
  0xdb   : > { %p665_p0 = pnand %p664_p11, %p658_p12 }
  0xdd   : > { %668 = shalt.err (!%p665_p0)
}
  0xde   : > { %536 = dma.vmem_to_hbm [thread:$0]  (%p958_p9), %s898_s5, 128, %s896_s9, %s417_s22  }
  0xdf PF: > { %s445_s27 = sand.u32 1, %s703_s15   ;;  %p959_p7 = scmp.ne.s32.totalorder %s954_s30, 0 }
  0xe0   : > { %p960_p13 = scmp.ge.s32.totalorder %s723_s20, 2  ;;  %s446_s6 = scalar_lea.sflag [#allocation4], %s445_s27 }
  0xe2   : > { %p543_p3 = pnand %p960_p13, %p959_p7 }
  0xe4   : > { %698 = dma.done.wait (!%p543_p3), %s446_s6, 128  }
  0xe5   : > { %700 = vsyncadd (!%p543_p3), %s446_s6, 4294967168  ;;  %s20_s20 = sadd.s32 1, %s723_s20   ;;  %s961_s15 = smov %s707_s16 }
  0xe6   : > { %p17_p6 = scmp.ge.s32.totalorder %s20_s20, 4   ;;  %s962_s16 = smov %s711_s17 }
  0xe7   : > { %s963_s17 = smov %s812_s29  ;;  %s964_s18 = smov %s719_s19 }
  0xe8   : > { %s965_s19 = smov %s967_s23  ;;  %19 = sbr.rel (!%p17_p6) target bundleno = 6 (0x6), region = 81 }
  0xef   :  { %451 = vsyncpa [#allocation3], 1 }
  0xf0   :  { %453 = vsyncpa [#allocation3 + $0x1], 1 }
  0xf1   :  { %454 = vsyncpa [#allocation4], 1 }
  0xf2   :  { %456 = vsyncpa [#allocation4 + $0x1], 1 }

</bundles_post_ra>
